<compile_context>
chip_gen: v5e
topology: v5e:2x2
jax: 0.10.0
libtpu: 0.0.40
codegen_flags: <defaults>
</compile_context>

<pallas_src>
import math
import functools

import jax
import jax.numpy as jnp
from jax import lax
from jax.experimental import pallas as pl
from jax.experimental.pallas import tpu as pltpu


def _round_up(x, m):
    return ((x + m - 1) // m) * m


def _prod(shape):
    p = 1
    for s in shape:
        p *= int(s)
    return p


def _vmem_budget_bytes():
    """Per-generation VMEM budget: ~85% of physical VMEM (v5e/v6e 128 MiB, v7x 64 MiB)."""
    try:
        cap = int(pltpu.get_tpu_info().vmem_capacity_bytes)
        return min(int(cap * 0.85), 110 * 1024 * 1024)
    except Exception:
        return 48 * 1024 * 1024   # conservative fallback: safe on v7x's 64 MiB


# ---------------------------------------------------------------------------
# Path A: whole masked weight resident in VMEM (DMA'd once); grid over M only.
# ---------------------------------------------------------------------------
def _resident_kernel(x_ref, w_ref, b_ref, o_ref):
    # x_ref: (tm, K_pad), w_ref: (N_pad, K_pad), b_ref: (1, N_pad), o_ref: (tm, N_pad)
    acc = lax.dot_general(
        x_ref[...], w_ref[...],
        dimension_numbers=(((1,), (1,)), ((), ())),
        preferred_element_type=jnp.float32)
    o_ref[...] = (acc + b_ref[...]).astype(o_ref.dtype)


# ---------------------------------------------------------------------------
# Path B: general (M, N, K) tiling, f32 accumulator, bias folded into the init.
# ---------------------------------------------------------------------------
def _tiled_kernel(x_ref, w_ref, b_ref, o_ref, acc_ref):
    # x_ref: (tm, tk), w_ref: (tn, tk), b_ref: (1, tn), o_ref/acc_ref: (tm, tn)
    k = pl.program_id(2)

    @pl.when(k == 0)
    def _():
        acc_ref[...] = jnp.broadcast_to(b_ref[...], acc_ref.shape)

    acc_ref[...] += lax.dot_general(
        x_ref[...], w_ref[...],
        dimension_numbers=(((1,), (1,)), ((), ())),
        preferred_element_type=jnp.float32)

    @pl.when(k == pl.num_programs(2) - 1)
    def _():
        o_ref[...] = acc_ref[...].astype(o_ref.dtype)


def random_sparse_linear(x, weight, mask, bias, *,
                         compute_dtype=jnp.bfloat16,
                         tm_max=512, tn_max=512, tk_max=1024,
                         force_tiled=False):
    """Forward pass of RandomSparseLinear.

    x:      (..., in_features)
    weight: (out_features, in_features)
    mask:   (in_features, out_features)  (elementwise vs weight; square layer)
    bias:   (out_features,)
    returns (..., out_features) float32
    """
    out_features, in_features = weight.shape
    assert mask.shape == (in_features, out_features)
    assert in_features == out_features, (
        "PyTorch module's elementwise `weight * mask` requires square dims")

    lead_shape = x.shape[:-1]
    M = _prod(lead_shape) if lead_shape else 1
    K = in_features
    N = out_features

    # Static masked-weight fusion, done ONCE (single XLA fusion, not per grid step).
    w_eff = (weight.astype(jnp.float32) * mask.astype(jnp.float32)).astype(compute_dtype)
    x2 = x.reshape(M, K).astype(compute_dtype)
    b2 = bias.astype(jnp.float32).reshape(1, N)   # bias stays f32 (exact add)

    itemsize = jnp.dtype(compute_dtype).itemsize
    budget = _vmem_budget_bytes()
    usable = int(budget * 0.9)

    K_pad = _round_up(K, 128)
    N_pad = _round_up(N, 128)
    tm = min(tm_max, _round_up(M, 8))

    # ---- Path A feasibility: hold the whole (N_pad, K_pad) masked weight in VMEM ----
    use_resident = False
    if not force_tiled:
        resident_fixed = 2 * N_pad * K_pad * itemsize + 2 * N_pad * 4   # W (dbl-buf) + bias
        per_row = 2 * K_pad * itemsize + 2 * N_pad * 4                  # x + out, dbl-buf
        if resident_fixed <= int(usable * 0.7):
            tm_fit = ((usable - resident_fixed) // per_row // 8) * 8
            if tm_fit >= 8:
                tm = min(tm, tm_fit)
                use_resident = True

    if use_resident:
        M_pad = _round_up(M, tm)
        if (M_pad, K_pad) != (M, K):
            x2 = jnp.pad(x2, ((0, M_pad - M), (0, K_pad - K)))
        if (N_pad, K_pad) != (N, K):
            w_eff = jnp.pad(w_eff, ((0, N_pad - N), (0, K_pad - K)))
        if N_pad != N:
            b2 = jnp.pad(b2, ((0, 0), (0, N_pad - N)))

        grid = (M_pad // tm,)
        cost = pl.CostEstimate(
            flops=2 * M_pad * N_pad * K_pad,
            transcendentals=0,
            bytes_accessed=(M_pad * K_pad * itemsize      # x, read once
                            + N_pad * K_pad * itemsize    # weight, DMA'd once
                            + N_pad * 4
                            + M_pad * N_pad * 4))

        out = pl.pallas_call(
            _resident_kernel,
            out_shape=jax.ShapeDtypeStruct((M_pad, N_pad), jnp.float32),
            grid_spec=pltpu.PrefetchScalarGridSpec(
                num_scalar_prefetch=0,
                grid=grid,
                in_specs=[
                    pl.BlockSpec((tm, K_pad), lambda i: (i, 0)),      # x tile
                    pl.BlockSpec((N_pad, K_pad), lambda i: (0, 0)),   # whole masked W
                    pl.BlockSpec((1, N_pad), lambda i: (0, 0)),       # bias row
                ],
                out_specs=pl.BlockSpec((tm, N_pad), lambda i: (i, 0)),
            ),
            compiler_params=pltpu.CompilerParams(
                dimension_semantics=("parallel",),
                vmem_limit_bytes=budget),
            cost_estimate=cost,
        )(x2, w_eff, b2)

        out = out[:M, :N]
        return out.reshape(*lead_shape, N)

    # ---- Path B: general (M, N, K) tiling with a VMEM f32 accumulator ----
    tn = min(tn_max, N_pad)
    tk = min(tk_max, K_pad)

    def _vm_est(tm_, tn_, tk_):
        return (2 * tm_ * tk_ * itemsize       # x tiles (double-buffered)
                + 2 * tn_ * tk_ * itemsize     # weight tiles (double-buffered)
                + 2 * tn_ * 4                  # bias
                + 2 * tm_ * tn_ * 4            # output tiles
                + tm_ * tn_ * 4)               # accumulator scratch

    while _vm_est(tm, tn, tk) > usable and (tm > 8 or tn > 128 or tk > 128):
        if tk > 128 and tk >= tn:
            tk = max(128, ((tk // 2) // 128) * 128)
        elif tn > 128:
            tn = max(128, ((tn // 2) // 128) * 128)
        else:
            tm = max(8, ((tm // 2) // 8) * 8)

    M_pad = _round_up(M, tm)
    N_pad = _round_up(N, tn)
    K_pad = _round_up(K, tk)

    if (M_pad, K_pad) != (M, K):
        x2 = jnp.pad(x2, ((0, M_pad - M), (0, K_pad - K)))
    if (N_pad, K_pad) != (N, K):
        w_eff = jnp.pad(w_eff, ((0, N_pad - N), (0, K_pad - K)))
    if N_pad != N:
        b2 = jnp.pad(b2, ((0, 0), (0, N_pad - N)))

    grid = (M_pad // tm, N_pad // tn, K_pad // tk)

    cost = pl.CostEstimate(
        flops=2 * M_pad * N_pad * K_pad,
        transcendentals=0,
        bytes_accessed=(M_pad * K_pad * itemsize * (N_pad // tn)   # x re-read per j
                        + N_pad * K_pad * itemsize * (M_pad // tm)  # W re-read per i
                        + N_pad * 4 * (M_pad // tm)
                        + M_pad * N_pad * 4))

    out = pl.pallas_call(
        _tiled_kernel,
        out_shape=jax.ShapeDtypeStruct((M_pad, N_pad), jnp.float32),
        grid_spec=pltpu.PrefetchScalarGridSpec(
            num_scalar_prefetch=0,
            grid=grid,
            in_specs=[
                pl.BlockSpec((tm, tk), lambda i, j, k: (i, k)),   # x tile
                pl.BlockSpec((tn, tk), lambda i, j, k: (j, k)),   # masked W tile
                pl.BlockSpec((1, tn), lambda i, j, k: (0, j)),    # bias row
            ],
            out_specs=pl.BlockSpec((tm, tn), lambda i, j, k: (i, j)),
            scratch_shapes=[pltpu.VMEM((tm, tn), jnp.float32)],
        ),
        compiler_params=pltpu.CompilerParams(
            dimension_semantics=("parallel", "parallel", "arbitrary"),
            vmem_limit_bytes=budget),
        cost_estimate=cost,
    )(x2, w_eff, b2)

    out = out[:M, :N]
    return out.reshape(*lead_shape, N)


def make_params(key, in_features, out_features, sparsity=0.5):
    """Deterministic parameter init mirroring the PyTorch module's __init__."""
    k_w, k_b, k_m = jax.random.split(key, 3)

    # kaiming_uniform_(weight, a=sqrt(5)) on (out, in): bound = 1/sqrt(fan_in)
    fan_in = in_features
    w_bound = 1.0 / math.sqrt(fan_in)
    weight = jax.random.uniform(k_w, (out_features, in_features),
                                jnp.float32, -w_bound, w_bound)

    # bias ~ U(-1/sqrt(fan_in), 1/sqrt(fan_in))
    b_bound = 1.0 / math.sqrt(fan_in)
    bias = jax.random.uniform(k_b, (out_features,), jnp.float32,
                              -b_bound, b_bound)

    # generate_random_sparse_mask(in, out, 0.5): exactly (1-sparsity)*total ones.
    total = in_features * out_features
    num_nonzero = int((1.0 - sparsity) * total)
    perm = jax.random.permutation(k_m, total)
    flat = jnp.zeros((total,), jnp.float32).at[perm[:num_nonzero]].set(1.0)
    mask = flat.reshape(in_features, out_features)

    return weight, bias, mask


if __name__ == "__main__":
    key = jax.random.PRNGKey(0)
    k_x, k_p, k_x2, k_p2 = jax.random.split(key, 4)

    # Small square layer (the PyTorch module's elementwise weight*mask requires square).
    in_features = out_features = 32
    batch, seq = 2, 8

    x = jax.random.normal(k_x, (batch, seq, in_features), jnp.float32)
    weight, bias, mask = make_params(k_p, in_features, out_features, sparsity=0.5)

    # Reference: same math as F.linear(x, W*mask, b), full-precision dot.
    w_masked = weight * mask
    y_ref = jnp.matmul(x, w_masked.T, precision=lax.Precision.HIGHEST) + bias

    # Default fast path: bf16 MXU inputs, f32 accumulation, weight-resident (Path A).
    y_fast = jax.block_until_ready(jax.jit(random_sparse_linear)(x, weight, mask, bias))
    assert y_fast.shape == (batch, seq, out_features)
    assert jnp.allclose(y_fast, y_ref, atol=5e-2, rtol=5e-2), \
        float(jnp.abs(y_fast - y_ref).max())

    # Bit-exact parity path (f32 MXU inputs) — matches PyTorch's .float() semantics.
    fwd_exact = jax.jit(functools.partial(random_sparse_linear,
                                          compute_dtype=jnp.float32))
    y_exact = jax.block_until_ready(fwd_exact(x, weight, mask, bias))
    assert jnp.allclose(y_exact, y_ref, atol=1e-5, rtol=1e-5), \
        float(jnp.abs(y_exact - y_ref).max())

    # Exercise the general tiled path (Path B: multi-step K reduction, acc scratch).
    in2 = out2 = 256
    x2 = jax.random.normal(k_x2, (4, 32, in2), jnp.float32)
    w2, b2, m2 = make_params(k_p2, in2, out2, sparsity=0.5)
    y2_ref = jnp.matmul(x2, (w2 * m2).T, precision=lax.Precision.HIGHEST) + b2
    fwd_tiled = jax.jit(functools.partial(random_sparse_linear,
                                          compute_dtype=jnp.float32,
                                          force_tiled=True, tn_max=128, tk_max=128))
    y2 = jax.block_until_ready(fwd_tiled(x2, w2, m2, b2))
    assert jnp.allclose(y2, y2_ref, atol=1e-3, rtol=1e-3), \
        float(jnp.abs(y2 - y2_ref).max())

    print("KERNEL_OK")
</pallas_src>

<mosaic_0001>
module attributes {stable_mosaic.version = 11 : i64} {
  func.func @_resident_kernel(%arg0: i32, %arg1: memref<16x128xbf16, #tpu.memory_space<vmem>>, %arg2: memref<128x128xbf16, #tpu.memory_space<vmem>>, %arg3: memref<1x128xf32, #tpu.memory_space<vmem>>, %arg4: memref<16x128xf32, #tpu.memory_space<vmem>>) attributes {dimension_semantics = [#tpu.dimension_semantics<parallel>], iteration_bounds = array<i64: 1>, scalar_prefetch = 0 : i64, scratch_operands = 0 : i64, tpu.core_type = #tpu.core_type<tc>, window_params = [{transform_indices = @transform_0, window_bounds = array<i64: 16, 128>}, {pipeline_mode = #tpu.pipeline_mode<synchronous>, transform_indices = @transform_1, window_bounds = array<i64: 128, 128>}, {pipeline_mode = #tpu.pipeline_mode<synchronous>, transform_indices = @transform_2, window_bounds = array<i64: 1, 128>}, {transform_indices = @transform_3, window_bounds = array<i64: 16, 128>}]} {
    %c0 = arith.constant 0 : index
    %c0_0 = arith.constant 0 : index
    %0 = vector.load %arg1[%c0, %c0_0] : memref<16x128xbf16, #tpu.memory_space<vmem>>, vector<16x128xbf16>
    %c0_1 = arith.constant 0 : index
    %c0_2 = arith.constant 0 : index
    %1 = vector.load %arg2[%c0_1, %c0_2] : memref<128x128xbf16, #tpu.memory_space<vmem>>, vector<128x128xbf16>
    %cst = arith.constant dense<0.000000e+00> : vector<16x128xf32>
    %2 = tpu.matmul %0, %1, %cst {dimension_numbers = #tpu.dot_dimension_numbers<[1], [1], [0], [0], [0, 0, 1, 0], [], []>} : vector<16x128xbf16>, vector<128x128xbf16>, vector<16x128xf32> -> vector<16x128xf32>
    %c0_3 = arith.constant 0 : index
    %c0_4 = arith.constant 0 : index
    %3 = vector.load %arg3[%c0_3, %c0_4] : memref<1x128xf32, #tpu.memory_space<vmem>>, vector<1x128xf32>
    %4 = vector.broadcast %3 : vector<1x128xf32> to vector<16x128xf32>
    %5 = arith.addf %2, %4 : vector<16x128xf32>
    %c0_5 = arith.constant 0 : index
    %c0_6 = arith.constant 0 : index
    %6 = vector.load %arg4[%c0_5, %c0_6] : memref<16x128xf32, #tpu.memory_space<vmem>>, vector<16x128xf32>
    tpu.vector_store %arg4[%c0_5, %c0_6], %5 {strides = array<i32>} : memref<16x128xf32, #tpu.memory_space<vmem>>, vector<16x128xf32>,
    return
  }
  func.func @transform_0(%arg0: i32) -> (i32, i32) {
    %c0_i32 = arith.constant 0 : i32
    %c0_i32_0 = arith.constant 0 : i32
    return %arg0, %c0_i32 : i32, i32
  }
  func.func @transform_1(%arg0: i32) -> (i32, i32) {
    %c0_i32 = arith.constant 0 : i32
    %c0_i32_0 = arith.constant 0 : i32
    %c0_i32_1 = arith.constant 0 : i32
    return %c0_i32, %c0_i32_0 : i32, i32
  }
  func.func @transform_2(%arg0: i32) -> (i32, i32) {
    %c0_i32 = arith.constant 0 : i32
    %c0_i32_0 = arith.constant 0 : i32
    %c0_i32_1 = arith.constant 0 : i32
    return %c0_i32, %c0_i32_0 : i32, i32
  }
  func.func @transform_3(%arg0: i32) -> (i32, i32) {
    %c0_i32 = arith.constant 0 : i32
    %c0_i32_0 = arith.constant 0 : i32
    return %arg0, %c0_i32 : i32, i32
  }
}

</mosaic_0001>

<bundles_post_ra>
// kernel: random_sparse_linear.1
= control target key start
LH: loop header
LB: loop body
LE: loop exit
PB: predicated region body
PF: predicated region fallthrough
CT: control target
= control target key end

     0   :  { %s212_s1 = inlined_call_operand.vmem [shape: bf16[128,128], index: 1, kind: input, shape index: {}]   ;;  %s213_s2 = inlined_call_operand.vmem [shape: f32[1,128], index: 2, kind: input, shape index: {}]   ;;  %s214_s0 = inlined_call_operand.vmem [shape: bf16[16,128], index: 0, kind: input, shape index: {}]   ;;  %s215_s3 = inlined_call_operand.vmem [shape: f32[16,128], index: 3, kind: output, shape index: {}]  }
   0x1   :  { %v154_v0 = vld [vmem:[%s212_s1 + $0x38] sm:$0xff]  ;;  %v153_v1 = vld [vmem:[%s212_s1 + $0x30] sm:$0xff]  ;;  %v152_v2 = vld [vmem:[%s212_s1 + $0x28] sm:$0xff] }
   0x2   :  { %90 = vmatpush.bf16.xpose.msra.mxu0 %v154_v0  ;;  %v151_v3 = vld [vmem:[%s212_s1 + $0x20] sm:$0xff]  ;;  %v150_v4 = vld [vmem:[%s212_s1 + $0x18] sm:$0xff]  ;;  %v149_v5 = vld [vmem:[%s212_s1 + $0x10] sm:$0xff] }
   0x3   :  { %v148_v6 = vld [vmem:[%s212_s1 + $0x8] sm:$0xff]  ;;  %v147_v7 = vld [vmem:[%s212_s1] sm:$0xff] }
   0x4   :  { %v146_v8 = vld [vmem:[%s214_s0] sm:$0xff] }
   0x5   :  { %v155_v9 = vld [vmem:[%s213_s2] ss:$0 sm:$0xff] }
   0xa   :  { %91 = vmatpush.bf16.xpose.msra.mxu0 %v153_v1 }
  0x12   :  { %92 = vmatpush.bf16.xpose.msra.mxu0 %v152_v2 }
  0x1a   :  { %93 = vmatpush.bf16.xpose.msra.mxu0 %v151_v3 }
  0x22   :  { %94 = vmatpush.bf16.xpose.msra.mxu0 %v150_v4 }
  0x2a   :  { %95 = vmatpush.bf16.xpose.msra.mxu0 %v149_v5 }
  0x32   :  { %96 = vmatpush.bf16.xpose.msra.mxu0 %v148_v6 }
  0x3a   :  { %97 = vmatpush.bf16.xpose.msra.mxu0 %v147_v7 }
  0x41   :  { %98 = vmatmul.bf16.vlgmr.msra.gmra.mxu0 %v146_v8 }
  0xbe   :  { %v99_v10 = vpop.f32.mrf.mxu0 }
  0xbf   :  { %v100_v11 = vadd.f32 %v155_v9, %v99_v10 }
  0xc1   :  { %104 = vst [vmem:[%s215_s3] sm:$0xff] %v100_v11 }
  0xc6   :  { %v101_v12 = vpop.f32.mrf.mxu0 }
  0xc7   :  { %v102_v13 = vadd.f32 %v155_v9, %v101_v12 }
  0xc9   :  { %105 = vst [vmem:[%s215_s3 + $0x8] sm:$0xff] %v102_v13 }

</bundles_post_ra>
